<compile_context>
chip_gen: v5e
topology: v5e:2x2
jax: 0.10.0
libtpu: 0.0.40
codegen_flags: <defaults>
</compile_context>

<pallas_src>
import functools

import jax
import jax.numpy as jnp
from jax.experimental import pallas as pl
from jax.experimental.pallas import tpu as pltpu


def _pixel_norm_kernel(x_ref, o_ref, *, eps, inv_c):
    # x_ref / o_ref: (BN, C, THW) block. Reduce over the channel axis (axis=1).
    x = x_ref[...].astype(jnp.float32)
    mean_sq = jnp.sum(x * x, axis=1, keepdims=True) * inv_c      # (BN, 1, THW)
    inv = jax.lax.rsqrt(mean_sq + eps)                           # (BN, 1, THW)
    o_ref[...] = (x * inv).astype(o_ref.dtype)                   # broadcast over C


def pixel_normalization(x, eps=1e-8):
    """x: (N, C, H, W) -> (N, C, H, W), normalized over the channel dim."""
    N, C, H, W = x.shape
    hw = H * W
    dtype_size = jnp.dtype(x.dtype).itemsize

    # ---- choose the spatial (lane) tile -------------------------------------
    # Small images: take the whole spatial extent as one block (no (8,128)
    # divisibility requirement when the block spans the full dim).
    # Large images: tile at 1024 lanes (multiple of 128) and pad the remainder.
    MAX_FULL_HW = 2048
    if hw <= MAX_FULL_HW:
        thw = hw
        hw_pad = hw
    else:
        thw = 1024
        hw_pad = ((hw + thw - 1) // thw) * thw

    x2d = x.reshape(N, C, hw)
    if hw_pad != hw:
        x2d = jnp.pad(x2d, ((0, 0), (0, 0), (0, hw_pad - hw)))
    n_hw_tiles = hw_pad // thw

    # ---- pack batch elements when blocks are tiny ---------------------------
    # Target ~1 MiB per block so per-grid-step overhead is amortized while
    # 2x double-buffered (in + out) blocks stay far under scoped VMEM limits
    # on all of v5e (16 MiB) / v6e (32 MiB) / v7x (32 MiB default, 64 MiB phys).
    block_bytes = C * thw * dtype_size
    target_block_bytes = 1 << 20
    max_bn = max(1, target_block_bytes // max(block_bytes, 1))
    bn = 1
    for cand in range(min(N, max_bn), 0, -1):
        if N % cand == 0:
            bn = cand
            break

    grid = (N // bn, n_hw_tiles)

    kernel = functools.partial(_pixel_norm_kernel, eps=float(eps), inv_c=1.0 / float(C))

    cost = pl.CostEstimate(
        flops=3 * N * C * hw,
        transcendentals=N * hw,
        bytes_accessed=2 * N * C * hw * dtype_size,
    )

    out = pl.pallas_call(
        kernel,
        out_shape=jax.ShapeDtypeStruct((N, C, hw_pad), x.dtype),
        grid_spec=pltpu.PrefetchScalarGridSpec(
            num_scalar_prefetch=0,
            grid=grid,
            in_specs=[pl.BlockSpec((bn, C, thw), lambda n, j: (n, 0, j))],
            out_specs=pl.BlockSpec((bn, C, thw), lambda n, j: (n, 0, j)),
        ),
        compiler_params=pltpu.CompilerParams(
            dimension_semantics=("parallel", "parallel"),
        ),
        cost_estimate=cost,
    )(x2d)

    if hw_pad != hw:
        out = out[:, :, :hw]
    return out.reshape(N, C, H, W)


def _reference(x, eps):
    # pure-JAX reference matching the PyTorch forward
    mean_sq = jnp.mean(x.astype(jnp.float32) ** 2, axis=1, keepdims=True)
    return (x.astype(jnp.float32) * jax.lax.rsqrt(mean_sq + eps)).astype(x.dtype)


if __name__ == "__main__":
    eps = 1e-8
    key = jax.random.PRNGKey(0)
    x = jax.random.normal(key, (2, 4, 16, 16), dtype=jnp.float32)

    y = pixel_normalization(x, eps=eps)
    y = jax.block_until_ready(y)

    y_ref = _reference(x, eps)
    assert y.shape == x.shape and y.dtype == x.dtype
    assert jnp.allclose(y, y_ref, atol=1e-5, rtol=1e-5)

    # also exercise the tiled (padded) path with a larger spatial extent
    x_big = jax.random.normal(jax.random.PRNGKey(1), (2, 8, 60, 60), dtype=jnp.float32)
    y_big = jax.block_until_ready(pixel_normalization(x_big, eps=eps))
    assert jnp.allclose(y_big, _reference(x_big, eps), atol=1e-5, rtol=1e-5)

    print("KERNEL_OK")
</pallas_src>

<mosaic_0001>
module attributes {stable_mosaic.version = 11 : i64} {
  func.func @_pixel_norm_kernel(%arg0: i32, %arg1: i32, %arg2: memref<2x4x256xf32, #tpu.memory_space<vmem>>, %arg3: memref<2x4x256xf32, #tpu.memory_space<vmem>>) attributes {dimension_semantics = [#tpu.dimension_semantics<parallel>, #tpu.dimension_semantics<parallel>], iteration_bounds = array<i64: 1, 1>, scalar_prefetch = 0 : i64, scratch_operands = 0 : i64, tpu.core_type = #tpu.core_type<tc>, window_params = [{transform_indices = @transform_0, window_bounds = array<i64: 2, 4, 256>}, {transform_indices = @transform_1, window_bounds = array<i64: 2, 4, 256>}]} {
    %c0 = arith.constant 0 : index
    %c0_0 = arith.constant 0 : index
    %c0_1 = arith.constant 0 : index
    %0 = vector.load %arg2[%c0, %c0_0, %c0_1] : memref<2x4x256xf32, #tpu.memory_space<vmem>>, vector<2x4x256xf32>
    %1 = arith.mulf %0, %0 : vector<2x4x256xf32>
    %cst = arith.constant dense<0.000000e+00> : vector<2x256xf32>
    %2 = vector.multi_reduction <add>, %1, %cst [1] : vector<2x4x256xf32> to vector<2x256xf32>
    %3 = vector.shape_cast %2 : vector<2x256xf32> to vector<2x1x256xf32>
    %cst_2 = arith.constant 2.500000e-01 : f32
    %4 = vector.broadcast %cst_2 : f32 to vector<2x1x256xf32>
    %5 = arith.mulf %3, %4 : vector<2x1x256xf32>
    %cst_3 = arith.constant 9.99999993E-9 : f32
    %6 = vector.broadcast %cst_3 : f32 to vector<2x1x256xf32>
    %7 = arith.addf %5, %6 : vector<2x1x256xf32>
    %8 = math.rsqrt %7 : vector<2x1x256xf32>
    %9 = vector.broadcast %8 : vector<2x1x256xf32> to vector<2x4x256xf32>
    %10 = arith.mulf %0, %9 : vector<2x4x256xf32>
    %c0_4 = arith.constant 0 : index
    %c0_5 = arith.constant 0 : index
    %c0_6 = arith.constant 0 : index
    %11 = vector.load %arg3[%c0_4, %c0_5, %c0_6] : memref<2x4x256xf32, #tpu.memory_space<vmem>>, vector<2x4x256xf32>
    tpu.vector_store %arg3[%c0_4, %c0_5, %c0_6], %10 {strides = array<i32>} : memref<2x4x256xf32, #tpu.memory_space<vmem>>, vector<2x4x256xf32>,
    return
  }
  func.func @transform_0(%arg0: i32, %arg1: i32) -> (i32, i32, i32) {
    %c0_i32 = arith.constant 0 : i32
    %c0_i32_0 = arith.constant 0 : i32
    return %arg0, %c0_i32, %arg1 : i32, i32, i32
  }
  func.func @transform_1(%arg0: i32, %arg1: i32) -> (i32, i32, i32) {
    %c0_i32 = arith.constant 0 : i32
    %c0_i32_0 = arith.constant 0 : i32
    return %arg0, %c0_i32, %arg1 : i32, i32, i32
  }
}

</mosaic_0001>

<bundles_post_ra>
// kernel: tpu_custom_call.1
= control target key start
LH: loop header
LB: loop body
LE: loop exit
PB: predicated region body
PF: predicated region fallthrough
CT: control target
= control target key end

     0   :  { %6 = vsyncpa [#allocation3], 0  ;;  %s258_s0 = inlined_call_operand.hbm [shape: f32[2,4,256], index: 0, kind: input, shape index: {}]   ;;  %s259_s1 = inlined_call_operand.hbm [shape: f32[2,4,256], index: 1, kind: output, shape index: {}]  }
   0x1   :  { %7 = vsyncpa [#allocation4], 0  ;;  %s12_s8 = sshll.u32 %s258_s0, 4  ;;  %s216_s9 = smov [#allocation2]   ;;  %s13_s8 = int_to_ptr.hbm [resolvable:$true] %s12_s8 }
   0x2   :  { %s14_s10 = sshll.u32 %s216_s9, 4  ;;  %s217_s11 = smov 128   ;;  %s15_s10 = int_to_ptr.vmem [resolvable:$true] %s14_s10 }
   0x3   :  { %s218_s12 = smov 8  }
   0x4   :  { %20 = dma.hbm_to_vmem [thread:$0]  %s13_s8, 256, %s15_s10, [#allocation3], %s217_s11, %s217_s11, %s218_s12  }
   0x5   :  { %212 = dma.done.wait [#allocation3], 256  }
   0x6   :  { %213 = vsyncadd [#allocation3], 4294967040  ;;  %v236_v0 = vld [vmem:[#allocation2] sm:$0xff]  ;;  %v238_v1 = vld [vmem:[#allocation2 + $0x8] sm:$0xff]  ;;  %vm42_vm0 = vcmask 1043456   ;;  %s219_s0 = smov [#allocation5]  }
   0x7   :  { %v27_v2 = vmul.f32 %v236_v0, %v236_v0  ;;  %v28_v3 = vmul.f32 %v238_v1, %v238_v1  ;;  %s137_s13 = sshll.u32 %s219_s0, 4  ;;  %s139_s16 = sshll.u32 %s259_s1, 4  ;;  %s138_s13 = int_to_ptr.vmem [resolvable:$true] %s137_s13  ;;  %s140_s16 = int_to_ptr.hbm [resolvable:$true] %s139_s16 }
   0x9   :  { %31 = vst [vmem:[#allocation1] ss:$2 sm:$0xff] %v27_v2 }
   0xa   :  { %35 = vst [vmem:[#allocation1 + $0x10] ss:$2 sm:$0xff] %v28_v3 }
  0x10   :  { %v32_v4 = vld.sshfl [vmem:[#allocation1] sm:$0xff pattern:$0x75316420]  ;;  %v33_v5 = vld.sshfl [vmem:[#allocation1 + $0x8] sm:$0xff pattern:$0x75316420] }
  0x11   :  { %v37_v6 = vld.sshfl [vmem:[#allocation1 + $0x18] sm:$0xff pattern:$0x75316420]  ;;  %v43_v7 = vsel %vm42_vm0, %v32_v4, 0.0  ;;  %v50_v8 = vsel %vm42_vm0, %v33_v5, 0.0 }
  0x12   :  { %v44_v9 = vrot.slane %v43_v7, 4  ;;  %v51_v10 = vrot.slane %v50_v8, 4  ;;  %v64_v11 = vsel %vm42_vm0, %v37_v6, 0.0  ;;  %v36_v12 = vld.sshfl [vmem:[#allocation1 + $0x10] sm:$0xff pattern:$0x75316420] }
  0x13   :  { %v65_v13 = vrot.slane %v64_v11, 4  ;;  %v57_v14 = vsel %vm42_vm0, %v36_v12, 0.0 }
  0x14   :  { %v45_v15 = vadd.f32 %v44_v9, %v43_v7  ;;  %v52_v16 = vadd.f32 %v51_v10, %v50_v8  ;;  %v58_v17 = vrot.slane %v57_v14, 4 }
  0x15   :  { %v66_v18 = vadd.f32 %v65_v13, %v64_v11 }
  0x16   :  { %v46_v19 = vrot.slane %v45_v15, 2  ;;  %v53_v20 = vrot.slane %v52_v16, 2  ;;  %v59_v21 = vadd.f32 %v58_v17, %v57_v14 }
  0x17   :  { %v67_v22 = vrot.slane %v66_v18, 2 }
  0x18   :  { %v47_v23 = vadd.f32 %v46_v19, %v45_v15  ;;  %v54_v24 = vadd.f32 %v53_v20, %v52_v16  ;;  %v60_v25 = vrot.slane %v59_v21, 2 }
  0x19   :  { %v68_v26 = vadd.f32 %v67_v22, %v66_v18 }
  0x1a   :  { %v48_v27 = vrot.slane %v47_v23, 1  ;;  %v55_v28 = vrot.slane %v54_v24, 1  ;;  %v61_v29 = vadd.f32 %v60_v25, %v59_v21 }
  0x1b   :  { %v69_v30 = vrot.slane %v68_v26, 1 }
  0x1c   :  { %v49_v31 = vadd.f32 %v48_v27, %v47_v23  ;;  %v56_v32 = vadd.f32 %v55_v28, %v54_v24  ;;  %v62_v33 = vrot.slane %v61_v29, 1 }
  0x1d   :  { %v70_v34 = vadd.f32 %v69_v30, %v68_v26 }
  0x1e   :  { %v71_v35 = vmul.f32 0.25, %v49_v31  ;;  %v72_v36 = vmul.f32 0.25, %v56_v32  ;;  %v63_v37 = vadd.f32 %v62_v33, %v61_v29 }
  0x1f   :  { %v74_v38 = vmul.f32 0.25, %v70_v34 }
  0x20   :  { %v75_v39 = vadd.f32 1e-08, %v71_v35  ;;  %v76_v40 = vadd.f32 1e-08, %v72_v36  ;;  %v73_v41 = vmul.f32 0.25, %v63_v37 }
  0x21   :  { %v78_v42 = vadd.f32 1e-08, %v74_v38 }
  0x22   :  { %156 = vrsqrt.f32 %v75_v39  ;;  %v77_v43 = vadd.f32 1e-08, %v73_v41  ;;  %vm95_vm3 = vweird.f32 %v76_v40  ;;  %vm85_vm5 = vweird.f32 %v75_v39 }
  0x23   :  { %158 = vrsqrt.f32 %v76_v40  ;;  %vm115_vm7 = vweird.f32 %v78_v42 }
  0x24   :  { %160 = vrsqrt.f32 %v77_v43  ;;  %vm105_vm11 = vweird.f32 %v77_v43 }
  0x25   :  { %162 = vrsqrt.f32 %v78_v42 }
  0x28   :  { %v157_v44 = vpop.eup %156 }
  0x29   :  { %v159_v45 = vpop.eup %158  ;;  %v80_v46 = vmul.f32 %v157_v44, %v75_v39  ;;  %vm86_vm2 = vweird.f32 %v157_v44 }
  0x2a   :  { %v161_v47 = vpop.eup %160  ;;  %v90_v48 = vmul.f32 %v159_v45, %v76_v40  ;;  %vm96_vm1 = vweird.f32 %v159_v45  ;;  %vm87_vm8 = vmor %vm85_vm5, %vm86_vm2 }
  0x2b   :  { %v163_v49 = vpop.eup %162  ;;  %v81_v50 = vmul.f32 %v157_v44, %v80_v46  ;;  %v100_v51 = vmul.f32 %v161_v47, %v77_v43  ;;  %vm97_vm6 = vmor %vm95_vm3, %vm96_vm1  ;;  %vm106_vm9 = vweird.f32 %v161_v47 }
  0x2c   :  { %v91_v52 = vmul.f32 %v159_v45, %v90_v48  ;;  %v110_v53 = vmul.f32 %v163_v49, %v78_v42  ;;  %vm116_vm4 = vweird.f32 %v163_v49  ;;  %vm107_vm12 = vmor %vm105_vm11, %vm106_vm9 }
  0x2d   :  { %v82_v54 = vmul.f32 0.5, %v81_v50  ;;  %v101_v55 = vmul.f32 %v161_v47, %v100_v51  ;;  %vm117_vm10 = vmor %vm115_vm7, %vm116_vm4 }
  0x2e   :  { %v92_v56 = vmul.f32 0.5, %v91_v52  ;;  %v111_v57 = vmul.f32 %v163_v49, %v110_v53 }
  0x2f   :  { %v83_v58 = vsub.f32 1.5, %v82_v54  ;;  %v102_v59 = vmul.f32 0.5, %v101_v55 }
  0x30   :  { %v93_v60 = vsub.f32 1.5, %v92_v56  ;;  %v112_v61 = vmul.f32 0.5, %v111_v57 }
  0x31   :  { %v103_v62 = vsub.f32 1.5, %v102_v59  ;;  %v84_v63 = vmul.f32 %v157_v44, %v83_v58 }
  0x32   :  { %v94_v2 = vmul.f32 %v159_v45, %v93_v60  ;;  %v113_v3 = vsub.f32 1.5, %v112_v61 }
  0x33   :  { %v104_v5 = vmul.f32 %v161_v47, %v103_v62  ;;  %v88_v8 = vsel %vm87_vm8, %v157_v44, %v84_v63 }
  0x34   :  { %v98_v4 = vsel %vm97_vm6, %v159_v45, %v94_v2  ;;  %v114_v6 = vmul.f32 %v163_v49, %v113_v3 }
  0x35   :  { %v123_v7 = vrot.slane %v98_v4, 4  ;;  %v108_v13 = vsel %vm107_vm12, %v161_v47, %v104_v5 }
  0x36   :  { %v118_v9 = vsel %vm117_vm10, %v163_v49, %v114_v6 }
  0x37   :  { %v125_v10 = vsel %vm42_vm0, %v88_v8, %v123_v7  ;;  %v124_v11 = vrot.slane %v118_v9, 4 }
  0x38   :  { %v129_v12 = vmul.f32 %v125_v10, %v236_v0 }
  0x39   :  { %v126_v14 = vsel %vm42_vm0, %v108_v13, %v124_v11 }
  0x3a   :  { %131 = vst [vmem:[#allocation5] sm:$0xff] %v129_v12  ;;  %v130_v15 = vmul.f32 %v126_v14, %v238_v1 }
  0x3c   :  { %132 = vst [vmem:[#allocation5 + $0x8] sm:$0xff] %v130_v15 }
  0x3d   :  { %145 = dma.vmem_to_hbm [thread:$0]  %s138_s13, 256, %s140_s16, [#allocation4], %s217_s11, %s217_s11, %s218_s12  }
  0x3e   :  { %214 = dma.done.wait [#allocation4], 256  }
  0x3f   :  { %215 = vsyncadd [#allocation4], 4294967040 }
  0x40   :  { %150 = vsyncpa [#allocation3], 1 }
  0x41   :  { %151 = vsyncpa [#allocation4], 1 }

</bundles_post_ra>
